<compile_context>
chip_gen: v6e
topology: v6e:2x2x1
jax: 0.10.0
libtpu: 0.0.40
codegen_flags: <defaults>
</compile_context>

<pallas_src>
import functools

import jax
import jax.numpy as jnp
from jax import lax
from jax.experimental import pallas as pl
from jax.experimental.pallas import tpu as pltpu


# ----------------------------------------------------------------------------
# Whole-batch-resident kernel (main path): one tile = [N, TF].
# ----------------------------------------------------------------------------
def _batchnorm_whole_batch_kernel(x_ref, gamma_ref, beta_ref, rm_ref, rv_ref,
                                  out_ref, new_rm_ref, new_rv_ref,
                                  *, eps, momentum, n_batch):
    # All arithmetic in f32; only the final store is cast to the output dtype
    # (avoids bf16 VPU assumptions on v5e and keeps scale/shift precision).
    x32 = x_ref[...].astype(jnp.float32)                       # [N, TF]
    mean = jnp.sum(x32, axis=0, keepdims=True) * (1.0 / n_batch)   # [1, TF]

    centered = x32 - mean                                       # [N, TF]
    # Two-pass variance (numerically stable; tile is already resident so this
    # is pure VALU work).  Unbiased divisor (N-1), like torch.var.
    denom = float(n_batch - 1) if n_batch > 1 else 1.0
    var = jnp.sum(centered * centered, axis=0, keepdims=True) * (1.0 / denom)

    scale = gamma_ref[...] * lax.rsqrt(var + eps)               # [1, TF]
    out_ref[...] = (centered * scale + beta_ref[...]).astype(out_ref.dtype)

    # Running-stat update (training=True path of the module).
    new_rm_ref[...] = momentum * rm_ref[...] + (1.0 - momentum) * mean
    new_rv_ref[...] = momentum * rv_ref[...] + (1.0 - momentum) * var


# ----------------------------------------------------------------------------
# Large-N fallback kernels: batch does not fit in VMEM, tile it.
# ----------------------------------------------------------------------------
def _stats_kernel(x_ref, sum_ref, sq_ref, *, n_batch, tn):
    i = pl.program_id(1)   # batch-tile index (last grid axis, "arbitrary")

    @pl.when(i == 0)
    def _():
        sum_ref[...] = jnp.zeros_like(sum_ref)
        sq_ref[...] = jnp.zeros_like(sq_ref)

    x32 = x_ref[...].astype(jnp.float32)                        # [TN, TF]
    rows = lax.broadcasted_iota(jnp.int32, x32.shape, 0) + i * tn
    x32 = jnp.where(rows < n_batch, x32, 0.0)                   # mask pad rows
    sum_ref[...] += jnp.sum(x32, axis=0, keepdims=True)
    sq_ref[...] += jnp.sum(x32 * x32, axis=0, keepdims=True)


def _scale_shift_kernel(x_ref, scale_ref, shift_ref, out_ref):
    out_ref[...] = (x_ref[...].astype(jnp.float32) * scale_ref[...]
                    + shift_ref[...]).astype(out_ref.dtype)


# ----------------------------------------------------------------------------
# Sizing helpers.
# ----------------------------------------------------------------------------
def _vmem_limit_bytes():
    """Generation-aware scoped-VMEM limit.

    v5e/v6e have 128 MiB physical VMEM per TensorCore, v7x only 64 MiB.  Use
    ~75% of physical, capped at 96 MiB, so v5e's 16 MiB / v6e's 32 MiB scoped
    defaults are lifted while v7x keeps double-buffering headroom (~48 MiB).
    """
    phys = 64 << 20   # conservative default = v7x per-TC VMEM
    try:
        phys = int(pltpu.get_tpu_info().vmem_capacity_bytes)
    except Exception:
        pass
    return min((phys * 3) // 4, 96 << 20)


def _choose_feature_tile(n, f, itemsize, budget):
    """Lane-dense feature tile (multiple of 128) fitting the VMEM budget.

    Returns None when the whole batch cannot stay resident even at a single
    128-lane tile (large-N fallback).
    """
    # VMEM residents per feature column: double-buffered x-in + out tiles at
    # their real element size, plus ~2 f32 intermediates (x32 / centered).
    bytes_per_col = n * (4 * itemsize + 8)
    max_cols = budget // max(1, bytes_per_col)
    if max_cols < min(f, 128):
        return None                      # whole batch doesn't fit -> fallback
    if f <= 128:
        return f                         # single full-extent block
    max_tf = (max_cols // 128) * 128
    f_lane_tiles = pl.cdiv(f, 128)
    tf = min(max_tf, f_lane_tiles * 128)
    if f_lane_tiles >= 2:
        # Keep >= 2 feature tiles so dimension_semantics=("parallel",) can
        # shard the grid across v7x's two TensorCores.
        tf = min(tf, -(-f_lane_tiles // 2) * 128)
    return tf


# ----------------------------------------------------------------------------
# Wrapper.
# ----------------------------------------------------------------------------
def batchnorm_forward(x, gamma, beta, running_mean, running_var,
                      *, eps=1e-5, momentum=0.9):
    """BatchNorm forward (training mode) on a [N, F] input.

    Returns (out [N, F], new_running_mean [F], new_running_var [F]).

    Note: for F well below 128 (like the 8x4 demo) the lane axis is only
    F/128 utilized and pallas_call overhead dominates; folding several
    independent BatchNorms into the lane axis (or letting XLA handle tiny
    shapes) would be faster -- kept as a plain Pallas kernel here.
    """
    n, f = x.shape
    itemsize = jnp.dtype(x.dtype).itemsize

    vmem_limit = _vmem_limit_bytes()
    budget = (vmem_limit * 4) // 5        # leave headroom under the limit

    gamma2 = gamma.reshape(1, f).astype(jnp.float32)
    beta2 = beta.reshape(1, f).astype(jnp.float32)
    rm2 = running_mean.reshape(1, f).astype(jnp.float32)
    rv2 = running_var.reshape(1, f).astype(jnp.float32)

    tf = _choose_feature_tile(n, f, itemsize, budget)
    if tf is None:
        return _batchnorm_batch_tiled(x, gamma2, beta2, rm2, rv2,
                                      eps=eps, momentum=momentum,
                                      budget=budget, vmem_limit=vmem_limit)

    kernel = functools.partial(_batchnorm_whole_batch_kernel,
                               eps=eps, momentum=momentum, n_batch=n)

    grid = (pl.cdiv(f, tf),)
    tile_spec = pl.BlockSpec((n, tf), lambda j: (0, j))   # x / out blocks
    row_spec = pl.BlockSpec((1, tf), lambda j: (0, j))    # gamma/beta/rm/rv

    out, new_rm, new_rv = pl.pallas_call(
        kernel,
        grid=grid,
        in_specs=[tile_spec, row_spec, row_spec, row_spec, row_spec],
        out_specs=(tile_spec, row_spec, row_spec),
        out_shape=(
            jax.ShapeDtypeStruct((n, f), x.dtype),
            jax.ShapeDtypeStruct((1, f), jnp.float32),
            jax.ShapeDtypeStruct((1, f), jnp.float32),
        ),
        # Alias running stats in -> out: no extra HBM buffers for them.
        input_output_aliases={3: 1, 4: 2},
        compiler_params=pltpu.CompilerParams(
            dimension_semantics=("parallel",),
            vmem_limit_bytes=vmem_limit,
        ),
    )(x, gamma2, beta2, rm2, rv2)

    return out, new_rm[0], new_rv[0]


def _batchnorm_batch_tiled(x, gamma2, beta2, rm2, rv2, *, eps, momentum,
                           budget, vmem_limit):
    """Fallback when the whole batch doesn't fit in VMEM: two passes over x.

    Pass 1 accumulates per-feature sum / sum-of-squares over batch tiles;
    scale/shift are finished on the tiny [1, F] arrays in JAX; pass 2 applies
    the elementwise FMA.  This is the minimum HBM traffic for this regime.
    """
    # TODO(synk): a fused single-read stats+normalize for the batch-tiled
    # regime would need a revisit-style grid (stats phase + normalize phase);
    # kept as two simple kernels here.
    n, f = x.shape
    itemsize = jnp.dtype(x.dtype).itemsize

    f_lane_tiles = pl.cdiv(f, 128)
    tf = f if f <= 128 else min(512, f_lane_tiles * 128)
    bytes_per_row = tf * (4 * itemsize + 8)
    tn = max(8, min((budget // max(1, bytes_per_row)) // 8 * 8, 4096))

    grid = (pl.cdiv(f, tf), pl.cdiv(n, tn))          # batch axis last (reduction)
    x_spec = pl.BlockSpec((tn, tf), lambda j, i: (i, j))
    stat_spec = pl.BlockSpec((1, tf), lambda j, i: (0, j))

    sums, sqs = pl.pallas_call(
        functools.partial(_stats_kernel, n_batch=n, tn=tn),
        grid=grid,
        in_specs=[x_spec],
        out_specs=(stat_spec, stat_spec),
        out_shape=(jax.ShapeDtypeStruct((1, f), jnp.float32),
                   jax.ShapeDtypeStruct((1, f), jnp.float32)),
        compiler_params=pltpu.CompilerParams(
            dimension_semantics=("parallel", "arbitrary"),
            vmem_limit_bytes=vmem_limit,
        ),
    )(x)

    mean = sums * (1.0 / n)
    denom = float(n - 1) if n > 1 else 1.0
    # One-pass form here; clamp guards catastrophic cancellation going negative.
    var = jnp.maximum(sqs - mean * sums, 0.0) * (1.0 / denom)
    scale = gamma2 * lax.rsqrt(var + eps)
    shift = beta2 - mean * scale

    out = pl.pallas_call(
        _scale_shift_kernel,
        grid=grid,
        in_specs=[x_spec, stat_spec, stat_spec],
        out_specs=x_spec,
        out_shape=jax.ShapeDtypeStruct((n, f), x.dtype),
        compiler_params=pltpu.CompilerParams(
            dimension_semantics=("parallel", "arbitrary"),
            vmem_limit_bytes=vmem_limit,
        ),
    )(x, scale, shift)

    new_rm = momentum * rm2 + (1.0 - momentum) * mean
    new_rv = momentum * rv2 + (1.0 - momentum) * var
    return out, new_rm[0], new_rv[0]


# ----------------------------------------------------------------------------
# Pure-JAX reference mirroring the PyTorch module's 2-D training path.
# ----------------------------------------------------------------------------
def batchnorm_reference(x, gamma, beta, running_mean, running_var,
                        *, eps=1e-5, momentum=0.9):
    n = x.shape[0]
    mean = jnp.mean(x, axis=0, keepdims=True)
    var = jnp.sum((x - mean) ** 2, axis=0, keepdims=True) / (n - 1)
    new_rm = momentum * running_mean + (1 - momentum) * mean[0]
    new_rv = momentum * running_var + (1 - momentum) * var[0]
    x_norm = (x - mean) / jnp.sqrt(var + eps)
    out = x_norm * gamma[None, :] + beta[None, :]
    return out, new_rm, new_rv


if __name__ == "__main__":
    num_features = 4
    batch = 8

    key = jax.random.PRNGKey(0)
    x = jax.random.normal(key, (batch, num_features), dtype=jnp.float32)

    # Deterministic parameter init matching the module's __init__.
    gamma = jnp.ones((num_features,), dtype=jnp.float32)
    beta = jnp.zeros((num_features,), dtype=jnp.float32)
    running_mean = jnp.zeros((num_features,), dtype=jnp.float32)
    running_var = jnp.ones((num_features,), dtype=jnp.float32)

    out, new_rm, new_rv = batchnorm_forward(
        x, gamma, beta, running_mean, running_var, eps=1e-5, momentum=0.9)
    jax.block_until_ready((out, new_rm, new_rv))

    ref_out, ref_rm, ref_rv = batchnorm_reference(
        x, gamma, beta, running_mean, running_var, eps=1e-5, momentum=0.9)

    assert jnp.allclose(out, ref_out, atol=1e-5, rtol=1e-5)
    assert jnp.allclose(new_rm, ref_rm, atol=1e-5, rtol=1e-5)
    assert jnp.allclose(new_rv, ref_rv, atol=1e-5, rtol=1e-5)

    print("KERNEL_OK")
</pallas_src>

<mosaic_0001>
module attributes {stable_mosaic.version = 11 : i64} {
  func.func @_batchnorm_whole_batch_kernel(%arg0: i32, %arg1: memref<8x4xf32, #tpu.memory_space<vmem>>, %arg2: memref<1x4xf32, #tpu.memory_space<vmem>>, %arg3: memref<1x4xf32, #tpu.memory_space<vmem>>, %arg4: memref<1x4xf32, #tpu.memory_space<vmem>>, %arg5: memref<1x4xf32, #tpu.memory_space<vmem>>, %arg6: memref<8x4xf32, #tpu.memory_space<vmem>>, %arg7: memref<1x4xf32, #tpu.memory_space<vmem>>, %arg8: memref<1x4xf32, #tpu.memory_space<vmem>>) attributes {dimension_semantics = [#tpu.dimension_semantics<parallel>], iteration_bounds = array<i64: 1>, scalar_prefetch = 0 : i64, scratch_operands = 0 : i64, tpu.core_type = #tpu.core_type<tc>, window_params = [{transform_indices = @transform_0, window_bounds = array<i64: 8, 4>}, {transform_indices = @transform_1, window_bounds = array<i64: 1, 4>}, {transform_indices = @transform_2, window_bounds = array<i64: 1, 4>}, {transform_indices = @transform_3, window_bounds = array<i64: 1, 4>}, {transform_indices = @transform_4, window_bounds = array<i64: 1, 4>}, {transform_indices = @transform_5, window_bounds = array<i64: 8, 4>}, {transform_indices = @transform_6, window_bounds = array<i64: 1, 4>}, {transform_indices = @transform_7, window_bounds = array<i64: 1, 4>}]} {
    %c0 = arith.constant 0 : index
    %c0_0 = arith.constant 0 : index
    %0 = vector.load %arg1[%c0, %c0_0] : memref<8x4xf32, #tpu.memory_space<vmem>>, vector<8x4xf32>
    %cst = arith.constant dense<0.000000e+00> : vector<4xf32>
    %1 = vector.multi_reduction <add>, %0, %cst [0] : vector<8x4xf32> to vector<4xf32>
    %2 = vector.shape_cast %1 : vector<4xf32> to vector<1x4xf32>
    %cst_1 = arith.constant 1.250000e-01 : f32
    %3 = vector.broadcast %cst_1 : f32 to vector<1x4xf32>
    %4 = arith.mulf %2, %3 : vector<1x4xf32>
    %5 = vector.broadcast %4 : vector<1x4xf32> to vector<8x4xf32>
    %6 = arith.subf %0, %5 : vector<8x4xf32>
    %7 = arith.mulf %6, %6 : vector<8x4xf32>
    %cst_2 = arith.constant dense<0.000000e+00> : vector<4xf32>
    %8 = vector.multi_reduction <add>, %7, %cst_2 [0] : vector<8x4xf32> to vector<4xf32>
    %9 = vector.shape_cast %8 : vector<4xf32> to vector<1x4xf32>
    %cst_3 = arith.constant 0.142857149 : f32
    %10 = vector.broadcast %cst_3 : f32 to vector<1x4xf32>
    %11 = arith.mulf %9, %10 : vector<1x4xf32>
    %c0_4 = arith.constant 0 : index
    %c0_5 = arith.constant 0 : index
    %12 = vector.load %arg2[%c0_4, %c0_5] : memref<1x4xf32, #tpu.memory_space<vmem>>, vector<1x4xf32>
    %cst_6 = arith.constant 9.99999974E-6 : f32
    %13 = vector.broadcast %cst_6 : f32 to vector<1x4xf32>
    %14 = arith.addf %11, %13 : vector<1x4xf32>
    %15 = math.rsqrt %14 : vector<1x4xf32>
    %16 = arith.mulf %12, %15 : vector<1x4xf32>
    %17 = vector.broadcast %16 : vector<1x4xf32> to vector<8x4xf32>
    %18 = arith.mulf %6, %17 : vector<8x4xf32>
    %c0_7 = arith.constant 0 : index
    %c0_8 = arith.constant 0 : index
    %19 = vector.load %arg3[%c0_7, %c0_8] : memref<1x4xf32, #tpu.memory_space<vmem>>, vector<1x4xf32>
    %20 = vector.broadcast %19 : vector<1x4xf32> to vector<8x4xf32>
    %21 = arith.addf %18, %20 : vector<8x4xf32>
    %c0_9 = arith.constant 0 : index
    %c0_10 = arith.constant 0 : index
    %22 = vector.load %arg6[%c0_9, %c0_10] : memref<8x4xf32, #tpu.memory_space<vmem>>, vector<8x4xf32>
    tpu.vector_store %arg6[%c0_9, %c0_10], %21 {strides = array<i32>} : memref<8x4xf32, #tpu.memory_space<vmem>>, vector<8x4xf32>,
    %c0_11 = arith.constant 0 : index
    %c0_12 = arith.constant 0 : index
    %23 = vector.load %arg4[%c0_11, %c0_12] : memref<1x4xf32, #tpu.memory_space<vmem>>, vector<1x4xf32>
    %cst_13 = arith.constant 0.899999976 : f32
    %24 = vector.broadcast %cst_13 : f32 to vector<1x4xf32>
    %25 = arith.mulf %24, %23 : vector<1x4xf32>
    %cst_14 = arith.constant 1.000000e-01 : f32
    %26 = vector.broadcast %cst_14 : f32 to vector<1x4xf32>
    %27 = arith.mulf %26, %4 : vector<1x4xf32>
    %28 = arith.addf %25, %27 : vector<1x4xf32>
    %c0_15 = arith.constant 0 : index
    %c0_16 = arith.constant 0 : index
    %29 = vector.load %arg7[%c0_15, %c0_16] : memref<1x4xf32, #tpu.memory_space<vmem>>, vector<1x4xf32>
    tpu.vector_store %arg7[%c0_15, %c0_16], %28 {strides = array<i32>} : memref<1x4xf32, #tpu.memory_space<vmem>>, vector<1x4xf32>,
    %c0_17 = arith.constant 0 : index
    %c0_18 = arith.constant 0 : index
    %30 = vector.load %arg5[%c0_17, %c0_18] : memref<1x4xf32, #tpu.memory_space<vmem>>, vector<1x4xf32>
    %cst_19 = arith.constant 0.899999976 : f32
    %31 = vector.broadcast %cst_19 : f32 to vector<1x4xf32>
    %32 = arith.mulf %31, %30 : vector<1x4xf32>
    %cst_20 = arith.constant 1.000000e-01 : f32
    %33 = vector.broadcast %cst_20 : f32 to vector<1x4xf32>
    %34 = arith.mulf %33, %11 : vector<1x4xf32>
    %35 = arith.addf %32, %34 : vector<1x4xf32>
    %c0_21 = arith.constant 0 : index
    %c0_22 = arith.constant 0 : index
    %36 = vector.load %arg8[%c0_21, %c0_22] : memref<1x4xf32, #tpu.memory_space<vmem>>, vector<1x4xf32>
    tpu.vector_store %arg8[%c0_21, %c0_22], %35 {strides = array<i32>} : memref<1x4xf32, #tpu.memory_space<vmem>>, vector<1x4xf32>,
    return
  }
  func.func @transform_0(%arg0: i32) -> (i32, i32) {
    %c0_i32 = arith.constant 0 : i32
    %c0_i32_0 = arith.constant 0 : i32
    return %c0_i32, %arg0 : i32, i32
  }
  func.func @transform_1(%arg0: i32) -> (i32, i32) {
    %c0_i32 = arith.constant 0 : i32
    %c0_i32_0 = arith.constant 0 : i32
    return %c0_i32, %arg0 : i32, i32
  }
  func.func @transform_2(%arg0: i32) -> (i32, i32) {
    %c0_i32 = arith.constant 0 : i32
    %c0_i32_0 = arith.constant 0 : i32
    return %c0_i32, %arg0 : i32, i32
  }
  func.func @transform_3(%arg0: i32) -> (i32, i32) {
    %c0_i32 = arith.constant 0 : i32
    %c0_i32_0 = arith.constant 0 : i32
    return %c0_i32, %arg0 : i32, i32
  }
  func.func @transform_4(%arg0: i32) -> (i32, i32) {
    %c0_i32 = arith.constant 0 : i32
    %c0_i32_0 = arith.constant 0 : i32
    return %c0_i32, %arg0 : i32, i32
  }
  func.func @transform_5(%arg0: i32) -> (i32, i32) {
    %c0_i32 = arith.constant 0 : i32
    %c0_i32_0 = arith.constant 0 : i32
    return %c0_i32, %arg0 : i32, i32
  }
  func.func @transform_6(%arg0: i32) -> (i32, i32) {
    %c0_i32 = arith.constant 0 : i32
    %c0_i32_0 = arith.constant 0 : i32
    return %c0_i32, %arg0 : i32, i32
  }
  func.func @transform_7(%arg0: i32) -> (i32, i32) {
    %c0_i32 = arith.constant 0 : i32
    %c0_i32_0 = arith.constant 0 : i32
    return %c0_i32, %arg0 : i32, i32
  }
}

</mosaic_0001>

<bundles_post_ra>
// kernel: tpu_custom_call.1
= control target key start
LH: loop header
LB: loop body
LE: loop exit
PB: predicated region body
PF: predicated region fallthrough
CT: control target
= control target key end

     0   :  { %vm24_vm0 = vcmask 31744   ;;  %vm67_vm1 = vcmask 24576   ;;  %v48_v28 = vlaneseq  ;;  %s158_s0 = inlined_call_operand.vmem [shape: f32[8,4], index: 0, kind: input, shape index: {}]   ;;  %s159_s3 = inlined_call_operand.vmem [shape: f32[1,4], index: 3, kind: input, shape index: {}, may-alias: {3,6}]   ;;  %s160_s6 = inlined_call_operand.vmem [shape: f32[1,4], index: 6, kind: output, shape index: {1}, may-alias: {3,6}]   ;;  %s161_s4 = inlined_call_operand.vmem [shape: f32[1,4], index: 4, kind: input, shape index: {}, may-alias: {4,7}]   ;;  %s162_s7 = inlined_call_operand.vmem [shape: f32[1,4], index: 7, kind: output, shape index: {2}, may-alias: {4,7}]   ;;  %s163_s1 = inlined_call_operand.vmem [shape: f32[1,4], index: 1, kind: input, shape index: {}]   ;;  %s164_s2 = inlined_call_operand.vmem [shape: f32[1,4], index: 2, kind: input, shape index: {}]   ;;  %s165_s5 = inlined_call_operand.vmem [shape: f32[8,4], index: 5, kind: output, shape index: {0}]  }
   0x1   :  { %v23_v0 = vld [vmem:[%s158_s0] sm:$0xff] }
   0x2   :  { %v25_v1 = vsel %vm24_vm0, %v23_v0, 0.0  ;;  %v63_v7 = vld [vmem:[%s159_s3] sm:$0x1]  ;;  %v49_v29 = vshrl.u32 %v48_v28, 7 }
   0x3   :  { %v26_v2 = vrot.slane %v25_v1, 4  ;;  %v64_v10 = vmul.f32 0.9, %v63_v7  ;;  %v69_v21 = vld [vmem:[%s161_s4] sm:$0x1] }
   0x4   :  { %v70_v24 = vmul.f32 0.9, %v69_v21  ;;  %v43_v30 = vld [vmem:[%s163_s1] sm:$0x1]  ;;  %v50_v31 = vsub.s32 0, %v49_v29 }
   0x5   :  { %v27_v3 = vadd.f32 %v26_v2, %v25_v1  ;;  %v86_v35 = vld [vmem:[%s164_s2] ss:$0 sm:$0xff] }
   0x7   :  { %v28_v4 = vrot.slane %v27_v3, 2 }
   0x9   :  { %v29_v5 = vadd.f32 %v28_v4, %v27_v3 }
   0xb   :  { %v30_v6 = vrot.slane %v29_v5, 1 }
   0xd   :  { %v31_v8 = vadd.f32 %v30_v6, %v29_v5 }
   0xf   :  { %v32_v9 = vmul.f32 0.125, %v31_v8 }
  0x11   :  { %v33_v11 = vsub.f32 %v23_v0, %v32_v9  ;;  %v65_v12 = vmul.f32 0.1, %v32_v9 }
  0x13   :  { %v34_v13 = vmul.f32 %v33_v11, %v33_v11  ;;  %v66_v14 = vadd.f32 %v65_v12, %v64_v10 }
  0x15   :  { %v35_v15 = vsel %vm24_vm0, %v34_v13, 0.0  ;;  %68 = vst.msk [vmem:[%s160_s6] sm:$0x1] %vm67_vm1, %v66_v14 }
  0x16   :  { %v36_v16 = vrot.slane %v35_v15, 4 }
  0x18   :  { %v37_v17 = vadd.f32 %v36_v16, %v35_v15 }
  0x1a   :  { %v38_v18 = vrot.slane %v37_v17, 2 }
  0x1c   :  { %v39_v19 = vadd.f32 %v38_v18, %v37_v17 }
  0x1e   :  { %v40_v20 = vrot.slane %v39_v19, 1 }
  0x20   :  { %v41_v22 = vadd.f32 %v40_v20, %v39_v19 }
  0x22   :  { %v42_v23 = vmul.f32 0.14285715, %v41_v22 }
  0x24   :  { %v44_v25 = vadd.f32 1e-05, %v42_v23  ;;  %v71_v26 = vmul.f32 0.1, %v42_v23 }
  0x26   :  { %87 = vrsqrt.f32 %v44_v25  ;;  %v72_v27 = vadd.f32 %v71_v26, %v70_v24 }
  0x28   :  { %73 = vst.msk [vmem:[%s162_s7] sm:$0x1] %vm67_vm1, %v72_v27 }
  0x33   :  { %v88_v32 = vpop.eup %87 }
  0x34   :  { %v46_v33 = vmul.f32 %v88_v32, %v43_v30 }
  0x36   :  { %v51_v34 = vrot.slane %v46_v33, %v50_v31 }
  0x38   :  { %v53_v36 = vmul.f32 %v51_v34, %v33_v11 }
  0x3a   :  { %v61_v37 = vadd.f32 %v86_v35, %v53_v36 }
  0x3c   :  { %62 = vst.msk [vmem:[%s165_s5] sm:$0xff] %vm24_vm0, %v61_v37 }

</bundles_post_ra>
